<compile_context>
chip_gen: v7x
topology: tpu7x:2x2x1
jax: 0.10.0
libtpu: 0.0.40
codegen_flags: <defaults>
</compile_context>

<pallas_src>
import functools

import jax
import jax.numpy as jnp
from jax.experimental import pallas as pl
from jax.experimental.pallas import tpu as pltpu


def _linear_kernel(x_ref, w_ref, b_ref, o_ref):
    # x_ref: (TM, D_in), w_ref: (D_in, D_pad), b_ref: (1, D_pad),
    # o_ref: (TM, D_pad)
    acc = jnp.dot(x_ref[...], w_ref[...], preferred_element_type=jnp.float32)
    o_ref[...] = (acc + b_ref[...]).astype(o_ref.dtype)


def _round_up(v, m):
    return ((v + m - 1) // m) * m


@functools.partial(jax.jit, static_argnames=("tm",))
def simple_regression_forward(x, w_t, b, *, tm=1024):
    """y = x @ w_t + b.

    x:   (N, D_in) float32
    w_t: (D_in, D_out) float32   (torch weight, pre-transposed)
    b:   (D_out,) float32
    """
    N, D_in = x.shape
    D_out = w_t.shape[1]

    # ---- lane-dense output padding (D_out -> multiple of 128) --------------
    D_pad = _round_up(max(D_out, 128), 128)
    if D_pad != D_out:
        w_t_p = jnp.pad(w_t, ((0, 0), (0, D_pad - D_out)))
        b_p = jnp.pad(b, ((0, D_pad - D_out),))
    else:
        w_t_p, b_p = w_t, b
    b2d = b_p.reshape(1, D_pad)

    # ---- batch tiling -------------------------------------------------------
    if N <= tm:
        # Single block equal to the full array dim (always a legal block shape).
        TM = N
        N_pad = N
        x_p = x
    else:
        TM = max(8, (tm // 8) * 8)            # sublane-aligned tile
        N_pad = _round_up(N, TM)
        x_p = jnp.pad(x, ((0, N_pad - N), (0, 0))) if N_pad != N else x

    grid = (N_pad // TM,)

    cost = pl.CostEstimate(
        flops=2 * N_pad * D_in * D_pad,
        transcendentals=0,
        bytes_accessed=4 * (N_pad * D_in + D_in * D_pad + D_pad + N_pad * D_pad),
    )

    out = pl.pallas_call(
        _linear_kernel,
        out_shape=jax.ShapeDtypeStruct((N_pad, D_pad), x.dtype),
        grid=grid,
        in_specs=[
            pl.BlockSpec((TM, D_in), lambda i: (i, 0)),      # x tiles (pipelined)
            pl.BlockSpec((D_in, D_pad), lambda i: (0, 0)),   # weight resident
            pl.BlockSpec((1, D_pad), lambda i: (0, 0)),      # bias resident
        ],
        out_specs=pl.BlockSpec((TM, D_pad), lambda i: (i, 0)),
        compiler_params=pltpu.CompilerParams(
            dimension_semantics=("parallel",),               # 2 TCs on v7x
        ),
        cost_estimate=cost,
    )(x_p, w_t_p, b2d)

    # Strip the lane / row padding (plain-JAX glue, fused by XLA).
    return out[:N, :D_out]


if __name__ == "__main__":
    # Small shapes consistent with the module: D_in=32, D_out=8, batch=16.
    N, D_in, D_out = 16, 32, 8

    key = jax.random.PRNGKey(0)
    kx, kw, kb = jax.random.split(key, 3)

    # Deterministic parameter init mimicking torch.nn.Linear default
    # (uniform in +/- 1/sqrt(D_in)).
    bound = 1.0 / jnp.sqrt(jnp.float32(D_in))
    w = jax.random.uniform(kw, (D_out, D_in), jnp.float32, -bound, bound)  # torch layout
    b = jax.random.uniform(kb, (D_out,), jnp.float32, -bound, bound)
    x = jax.random.normal(kx, (N, D_in), jnp.float32)

    # Pre-transpose weight (glue in plain JAX).
    w_t = w.T  # (D_in, D_out)

    y = simple_regression_forward(x, w_t, b)
    y = jax.block_until_ready(y)

    # Reference check against plain JAX (same math as torch.nn.Linear).
    y_ref = x @ w.T + b
    assert y.shape == (N, D_out)
    assert jnp.allclose(y, y_ref, atol=1e-5, rtol=1e-5)

    print("KERNEL_OK")
</pallas_src>

<mosaic_0001>
module attributes {stable_mosaic.version = 11 : i64} {
  func.func @_linear_kernel(%arg0: i32, %arg1: memref<16x32xf32, #tpu.memory_space<vmem>>, %arg2: memref<32x128xf32, #tpu.memory_space<vmem>>, %arg3: memref<1x128xf32, #tpu.memory_space<vmem>>, %arg4: memref<16x128xf32, #tpu.memory_space<vmem>>) attributes {dimension_semantics = [#tpu.dimension_semantics<parallel>], iteration_bounds = array<i64: 1>, scalar_prefetch = 0 : i64, scratch_operands = 0 : i64, tpu.core_type = #tpu.core_type<tc>, window_params = [{transform_indices = @transform_0, window_bounds = array<i64: 16, 32>}, {pipeline_mode = #tpu.pipeline_mode<synchronous>, transform_indices = @transform_1, window_bounds = array<i64: 32, 128>}, {pipeline_mode = #tpu.pipeline_mode<synchronous>, transform_indices = @transform_2, window_bounds = array<i64: 1, 128>}, {transform_indices = @transform_3, window_bounds = array<i64: 16, 128>}]} {
    %c0 = arith.constant 0 : index
    %c0_0 = arith.constant 0 : index
    %0 = vector.load %arg1[%c0, %c0_0] : memref<16x32xf32, #tpu.memory_space<vmem>>, vector<16x32xf32>
    %c0_1 = arith.constant 0 : index
    %c0_2 = arith.constant 0 : index
    %1 = vector.load %arg2[%c0_1, %c0_2] : memref<32x128xf32, #tpu.memory_space<vmem>>, vector<32x128xf32>
    %cst = arith.constant dense<0.000000e+00> : vector<16x128xf32>
    %2 = tpu.matmul %0, %1, %cst {dimension_numbers = #tpu.dot_dimension_numbers<[1], [0], [0], [1], [0, 0, 1, 1], [], []>} : vector<16x32xf32>, vector<32x128xf32>, vector<16x128xf32> -> vector<16x128xf32>
    %c0_3 = arith.constant 0 : index
    %c0_4 = arith.constant 0 : index
    %3 = vector.load %arg3[%c0_3, %c0_4] : memref<1x128xf32, #tpu.memory_space<vmem>>, vector<1x128xf32>
    %4 = vector.broadcast %3 : vector<1x128xf32> to vector<16x128xf32>
    %5 = arith.addf %2, %4 : vector<16x128xf32>
    %c0_5 = arith.constant 0 : index
    %c0_6 = arith.constant 0 : index
    %6 = vector.load %arg4[%c0_5, %c0_6] : memref<16x128xf32, #tpu.memory_space<vmem>>, vector<16x128xf32>
    tpu.vector_store %arg4[%c0_5, %c0_6], %5 {strides = array<i32>} : memref<16x128xf32, #tpu.memory_space<vmem>>, vector<16x128xf32>,
    return
  }
  func.func @transform_0(%arg0: i32) -> (i32, i32) {
    %c0_i32 = arith.constant 0 : i32
    %c0_i32_0 = arith.constant 0 : i32
    return %arg0, %c0_i32 : i32, i32
  }
  func.func @transform_1(%arg0: i32) -> (i32, i32) {
    %c0_i32 = arith.constant 0 : i32
    %c0_i32_0 = arith.constant 0 : i32
    %c0_i32_1 = arith.constant 0 : i32
    return %c0_i32, %c0_i32_0 : i32, i32
  }
  func.func @transform_2(%arg0: i32) -> (i32, i32) {
    %c0_i32 = arith.constant 0 : i32
    %c0_i32_0 = arith.constant 0 : i32
    %c0_i32_1 = arith.constant 0 : i32
    return %c0_i32, %c0_i32_0 : i32, i32
  }
  func.func @transform_3(%arg0: i32) -> (i32, i32) {
    %c0_i32 = arith.constant 0 : i32
    %c0_i32_0 = arith.constant 0 : i32
    return %arg0, %c0_i32 : i32, i32
  }
}

</mosaic_0001>

<bundles_post_ra>
// kernel: simple_regression_forward.1
= control target key start
LH: loop header
LB: loop body
LE: loop exit
PB: predicated region body
PF: predicated region fallthrough
CT: control target
= control target key end

     0   :  { %vm27_vm0 = vcmask 261120   ;;  %s190_s1 = inlined_call_operand.vmem [shape: f32[32,128], index: 1, kind: input, shape index: {}]   ;;  %s191_s0 = inlined_call_operand.vmem [shape: f32[16,32], index: 0, kind: input, shape index: {}]   ;;  %s192_s2 = inlined_call_operand.vmem [shape: f32[1,128], index: 2, kind: input, shape index: {}]   ;;  %s193_s3 = inlined_call_operand.vmem [shape: f32[16,128], index: 3, kind: output, shape index: {}]  }
   0x1   :  { %v16_v0 = vld [vmem:[%s190_s1] sm:$0xff]  ;;  %v17_v1 = vld [vmem:[%s190_s1 + $0x8] sm:$0xff]  ;;  %v18_v2 = vld [vmem:[%s190_s1 + $0x10] sm:$0xff] }
   0x2   :  { %v135_v3 = vpack.c.bf16 %v17_v1, %v16_v0  ;;  %v19_v4 = vld [vmem:[%s190_s1 + $0x18] sm:$0xff]  ;;  %v14_v5 = vld [vmem:[%s191_s0] sm:$0xff]  ;;  %v15_v7 = vld [vmem:[%s191_s0 + $0x8] sm:$0xff] }
   0x3   :  { %v139_v6 = vpack.c.bf16 %v19_v4, %v18_v2  ;;  %132 = vmatprep.mubr.msk.f32.mxu0 %vm27_vm0, %v14_v5  ;;  %v115_v8 = vld [vmem:[%s192_s2] ss:$0 sm:$0xff] }
   0x4   :  { %136 = vmatprep.subr.bf16.mxu0 %v135_v3 }
   0x5   :  { %138 = vmatpush3.bf16.msra.mxu0 %v135_v3 }
   0x6   :  { %140 = vmatprep.subr.bf16.mxu0 %v139_v6 }
   0x9   :  { %142 = vmatpush3.bf16.msra.mxu0 %v139_v6 }
   0xc   :  { %133 = vmatmul.mubr.msk.f32.vlgmr.msra.gmra.mrb[0].mxu0 %vm27_vm0, %v15_v7 }
  0xdf   :  { %v134_v9 = vpop.f32.mrb[0].mxu0 }
  0xe0   :  { %v106_v10 = vadd.f32 %v134_v9, %v115_v8  ;;  %v100_v11 = vpop.f32.mrb[1].mxu0 }
  0xe1   :  { %v101_v12 = vadd.f32 %v115_v8, %v100_v11 }
  0xe2   :  { %110 = vst [vmem:[%s193_s3 + $0x8] sm:$0xff] %v106_v10 }
  0xe3   :  { %109 = vst [vmem:[%s193_s3] sm:$0xff] %v101_v12 }

</bundles_post_ra>
